<compile_context>
chip_gen: v7x
topology: tpu7x:2x2x1
jax: 0.10.0
libtpu: 0.0.40
codegen_flags: <defaults>
</compile_context>

<pallas_src>
import functools

import jax
import jax.numpy as jnp
from jax.experimental import pallas as pl
from jax.experimental.pallas import tpu as pltpu


def _round_up(x, m):
    return (x + m - 1) // m * m


def _lstm_stack_kernel(x_hbm, wih_ref, whh_ref, b_ref,
                       hN_ref, cN_ref,
                       act_sc, gx_sc, dma_sem,
                       *, H, Tc, num_full, rem):
    """Grid = (batch_tiles [parallel], layers [arbitrary]).

    x_hbm   : (nb, S, Bt, F) bf16 in HBM (memory_space=pl.ANY), DMA'd once per tile
    wih_ref : (1, F, G) bf16  this layer's W_ih^T (gate-packed, contraction padded)
    whh_ref : (1, H, G) bf16  this layer's W_hh^T (gate-packed)
    b_ref   : (1, 1, G) f32   this layer's b_ih + b_hh (gate-packed)
    hN_ref  : (1, Bt, H) f32  final hidden state of this layer / batch tile
    cN_ref  : (1, Bt, H) f32  final cell state
    act_sc  : (S, Bt, F) bf16 VMEM: layer input/output sequence (persists per tile)
    gx_sc   : (Tc, Bt, G) f32 VMEM: time-chunked hoisted input-projection gates
    dma_sem : DMA semaphore for the layer-0 seed copy
    """
    b_idx = pl.program_id(0)
    layer = pl.program_id(1)
    S, Bt, F = act_sc.shape
    G = gx_sc.shape[2]

    # Layer 0 seeds the VMEM activation buffer with this batch tile's padded,
    # time-major input directly from HBM; later layers read the previous layer's h.
    @pl.when(layer == 0)
    def _():
        cp = pltpu.make_async_copy(x_hbm.at[b_idx], act_sc, dma_sem)
        cp.start()
        cp.wait()

    wih = wih_ref[0]          # (F, G) bf16, loop-invariant
    whh = whh_ref[0]          # (H, G) bf16, loop-invariant
    bias = b_ref[0]           # (1, G) f32

    def project(t_start, length):
        # Hoisted input projection for one time chunk: a single well-shaped bf16
        # MXU GEMM; only h @ W_hh remains on the sequential critical path.
        xs = act_sc[pl.ds(t_start, length)]                       # (length, Bt, F) bf16
        gx = jnp.dot(xs.reshape(length * Bt, F), wih,
                     preferred_element_type=jnp.float32) + bias   # (length*Bt, G) f32
        gx_sc[pl.ds(0, length)] = gx.reshape(length, Bt, G)

    def make_step(t_base):
        def step(i, carry):
            h, c = carry                                          # f32 carries
            g = gx_sc[i] + jnp.dot(h.astype(jnp.bfloat16), whh,
                                   preferred_element_type=jnp.float32)  # (Bt, G)
            # PyTorch gate order [i, f, g, o], packed contiguously in lanes [0, 4H).
            if H % 128 == 0:
                # Lane-aligned gate blocks: slice first, per-gate nonlinearity.
                i_g = jax.nn.sigmoid(g[:, 0 * H:1 * H])
                f_g = jax.nn.sigmoid(g[:, 1 * H:2 * H])
                g_g = jnp.tanh(g[:, 2 * H:3 * H])
                o_g = jax.nn.sigmoid(g[:, 3 * H:4 * H])
            else:
                # Gates share vregs (H < 128): 2 packed EUP passes, then slice.
                sg = jax.nn.sigmoid(g)
                th = jnp.tanh(g)
                i_g = sg[:, 0 * H:1 * H]
                f_g = sg[:, 1 * H:2 * H]
                g_g = th[:, 2 * H:3 * H]
                o_g = sg[:, 3 * H:4 * H]
            c_new = f_g * c + i_g * g_g
            h_new = o_g * jnp.tanh(c_new)
            # Feed the next layer; padded columns [H:F] are never multiplied by
            # nonzero weights, so a partial-lane store is sufficient.
            act_sc[t_base + i, :, 0:H] = h_new.astype(jnp.bfloat16)
            return (h_new, c_new)
        return step

    h0 = jnp.zeros((Bt, H), jnp.float32)
    c0 = jnp.zeros((Bt, H), jnp.float32)

    step_unroll = max(1, min(Tc, 8))

    def chunk_body(ck, carry):
        t0 = ck * Tc
        project(t0, Tc)
        return jax.lax.fori_loop(0, Tc, make_step(t0), carry, unroll=step_unroll)

    carry = jax.lax.fori_loop(0, num_full, chunk_body, (h0, c0))

    if rem:  # static remainder chunk (S not a multiple of Tc)
        t0 = num_full * Tc
        project(t0, rem)
        carry = jax.lax.fori_loop(0, rem, make_step(t0), carry,
                                  unroll=max(1, min(rem, 8)))

    h_n, c_n = carry
    hN_ref[0] = h_n.astype(hN_ref.dtype)
    cN_ref[0] = c_n.astype(cN_ref.dtype)


def _pack_params(params, F, G, H):
    """Stack per-layer PyTorch-layout LSTM params into gate-packed, transposed,
    bf16 tensors of common shape.

    Returns wih_all (L, F, G) bf16, whh_all (L, H, G) bf16, b_all (L, 1, G) f32.
    Gate g occupies columns [g*H, (g+1)*H); padded rows/columns are zero so padding
    never perturbs the real lanes (given zero initial state).
    """
    wih_all, whh_all, b_all = [], [], []
    for (w_ih, w_hh, b_ih, b_hh) in params:
        d_in = w_ih.shape[1]
        wih_p = jnp.zeros((F, G), jnp.float32).at[:d_in, :4 * H].set(w_ih.T)
        whh_p = jnp.zeros((H, G), jnp.float32).at[:H, :4 * H].set(w_hh.T)
        b_p = jnp.zeros((1, G), jnp.float32).at[0, :4 * H].set(b_ih + b_hh)
        wih_all.append(wih_p)
        whh_all.append(whh_p)
        b_all.append(b_p)
    return (jnp.stack(wih_all).astype(jnp.bfloat16),
            jnp.stack(whh_all).astype(jnp.bfloat16),
            jnp.stack(b_all))


def lstm_encoder_forward(x_bsd, params):
    """Equivalent of LSTM_Encoder.forward.  x_bsd: (B, S, D). Returns (hidden, cell)."""
    B, S, Din = x_bsd.shape
    H = params[0][1].shape[1]
    L = len(params)

    F = _round_up(max(Din, H), 128)     # lane-dense contraction / activation width
    G = _round_up(4 * H, 128)           # packed gate axis

    # Batch tiling: >=2 tiles of >=8 rows enables megacore sharding on v7x.
    if B > 8:
        nb = 2
        Bp = _round_up(B, 16)
    else:
        nb = 1
        Bp = _round_up(B, 8)
    Bt = Bp // nb

    Tc = max(1, min(S, 64))             # time chunk for the hoisted input projection
    num_full = S // Tc
    rem = S - num_full * Tc

    wih_all, whh_all, b_all = _pack_params(params, F, G, H)

    # Time-major, zero-padded, batch-tiled bf16 input slab (nb, S, Bt, F) kept in HBM.
    x_t = jnp.transpose(x_bsd, (1, 0, 2)).astype(jnp.bfloat16)   # (S, B, Din)
    x_pad = jnp.zeros((S, Bp, F), jnp.bfloat16).at[:, :B, :Din].set(x_t)
    x_tiles = x_pad.reshape(S, nb, Bt, F).transpose(1, 0, 2, 3)

    # Explicit scoped-VMEM budget: scratch + double-buffered weight/bias/out blocks.
    act_bytes = S * Bt * F * 2
    gx_bytes = Tc * Bt * G * 4
    w_bytes = 2 * ((F * G + H * G) * 2 + G * 4)
    out_bytes = 2 * 2 * (Bt * H * 4)
    need = act_bytes + gx_bytes + w_bytes + out_bytes
    vmem_limit = int(min(max(need * 1.4 + (4 << 20), 16 << 20), 100 << 20))

    kernel = functools.partial(_lstm_stack_kernel, H=H, Tc=Tc,
                               num_full=num_full, rem=rem)

    hN, cN = pl.pallas_call(
        kernel,
        out_shape=(
            jax.ShapeDtypeStruct((L, Bp, H), jnp.float32),
            jax.ShapeDtypeStruct((L, Bp, H), jnp.float32),
        ),
        grid_spec=pltpu.PrefetchScalarGridSpec(
            num_scalar_prefetch=0,
            grid=(nb, L),
            in_specs=[
                pl.BlockSpec(memory_space=pl.ANY),                     # x tiles (HBM)
                pl.BlockSpec((1, F, G), lambda b, l: (l, 0, 0)),       # W_ih^T per layer
                pl.BlockSpec((1, H, G), lambda b, l: (l, 0, 0)),       # W_hh^T per layer
                pl.BlockSpec((1, 1, G), lambda b, l: (l, 0, 0)),       # bias per layer
            ],
            out_specs=[
                pl.BlockSpec((1, Bt, H), lambda b, l: (l, b, 0)),
                pl.BlockSpec((1, Bt, H), lambda b, l: (l, b, 0)),
            ],
            scratch_shapes=[
                pltpu.VMEM((S, Bt, F), jnp.bfloat16),    # activation sequence (layer I/O)
                pltpu.VMEM((Tc, Bt, G), jnp.float32),    # time-chunked input-proj gates
                pltpu.SemaphoreType.DMA,                 # layer-0 seed copy
            ],
        ),
        compiler_params=pltpu.CompilerParams(
            dimension_semantics=("parallel", "arbitrary"),   # batch tiles || , layers seq
            vmem_limit_bytes=vmem_limit),
    )(x_tiles, wih_all, whh_all, b_all)

    # TODO(synk): inter-layer dropout skipped (eval-mode semantics of nn.LSTM).
    # TODO(synk): the chunked input-projection GEMM is issued just-in-time; a further
    # win is double-buffering gx chunks (async GEMM for chunk k+1 while the recurrence
    # consumes chunk k) and splitting the gate math over G for very large Bt*G.
    hidden = hN[:, :B, :]
    cell = cN[:, :B, :]
    return hidden, cell


def init_lstm_params(key, input_dim, hidden_dim, n_layers):
    """Deterministic PyTorch-style init: U(-1/sqrt(H), 1/sqrt(H))."""
    k = 1.0 / jnp.sqrt(jnp.asarray(hidden_dim, jnp.float32))
    params = []
    for layer in range(n_layers):
        d_in = input_dim if layer == 0 else hidden_dim
        key, k1, k2, k3, k4 = jax.random.split(key, 5)
        w_ih = jax.random.uniform(k1, (4 * hidden_dim, d_in), jnp.float32, -k, k)
        w_hh = jax.random.uniform(k2, (4 * hidden_dim, hidden_dim), jnp.float32, -k, k)
        b_ih = jax.random.uniform(k3, (4 * hidden_dim,), jnp.float32, -k, k)
        b_hh = jax.random.uniform(k4, (4 * hidden_dim,), jnp.float32, -k, k)
        params.append((w_ih, w_hh, b_ih, b_hh))
    return params


def _reference_lstm(x_bsd, params):
    """Pure-JAX f32 reference (same math, lax.scan) for correctness check."""
    x = jnp.transpose(x_bsd, (1, 0, 2))
    hs, cs = [], []
    for (w_ih, w_hh, b_ih, b_hh) in params:
        B = x.shape[1]
        H = w_hh.shape[1]

        def step(carry, x_t):
            h, c = carry
            g = x_t @ w_ih.T + h @ w_hh.T + b_ih + b_hh
            i, f, gg, o = jnp.split(g, 4, axis=-1)
            c_new = jax.nn.sigmoid(f) * c + jax.nn.sigmoid(i) * jnp.tanh(gg)
            h_new = jax.nn.sigmoid(o) * jnp.tanh(c_new)
            return (h_new, c_new), h_new

        (h_n, c_n), outs = jax.lax.scan(
            step, (jnp.zeros((B, H)), jnp.zeros((B, H))), x)
        x = outs
        hs.append(h_n)
        cs.append(c_n)
    return jnp.stack(hs, 0), jnp.stack(cs, 0)


if __name__ == "__main__":
    # Small shapes consistent with the module: batch=2, seq=8, input_dim=4,
    # hidden_dim=32, n_layers=2.
    B, S, D_IN, H, N_LAYERS = 2, 8, 4, 32, 2

    key = jax.random.PRNGKey(0)
    key, kx = jax.random.split(key)
    x_context = jax.random.normal(kx, (B, S, D_IN), jnp.float32)
    params = init_lstm_params(key, D_IN, H, N_LAYERS)

    fwd = jax.jit(lstm_encoder_forward)
    hidden, cell = fwd(x_context, params)
    jax.block_until_ready((hidden, cell))

    assert hidden.shape == (N_LAYERS, B, H) and cell.shape == (N_LAYERS, B, H)

    # bf16 MXU operands (f32 accumulation) -> tolerance loosened vs the f32 reference.
    h_ref, c_ref = _reference_lstm(x_context, params)
    assert jnp.allclose(hidden, h_ref, atol=2e-2, rtol=2e-2), (
        float(jnp.max(jnp.abs(hidden - h_ref))))
    assert jnp.allclose(cell, c_ref, atol=2e-2, rtol=2e-2), (
        float(jnp.max(jnp.abs(cell - c_ref))))

    print("KERNEL_OK")
</pallas_src>

<mosaic_0001>
module attributes {stable_mosaic.version = 11 : i64} {
  func.func @_lstm_stack_kernel(%arg0: i32, %arg1: i32, %arg2: memref<1x8x8x128xbf16, #tpu.memory_space<any>>, %arg3: memref<1x128x128xbf16, #tpu.memory_space<vmem>>, %arg4: memref<1x32x128xbf16, #tpu.memory_space<vmem>>, %arg5: memref<1x1x128xf32, #tpu.memory_space<vmem>>, %arg6: memref<1x8x32xf32, #tpu.memory_space<vmem>>, %arg7: memref<1x8x32xf32, #tpu.memory_space<vmem>>, %arg8: memref<8x8x128xbf16, #tpu.memory_space<vmem>>, %arg9: memref<8x8x128xf32, #tpu.memory_space<vmem>>, %arg10: memref<!tpu.dma_semaphore, #tpu.memory_space<semaphore_mem>>) attributes {dimension_semantics = [#tpu.dimension_semantics<parallel>, #tpu.dimension_semantics<arbitrary>], iteration_bounds = array<i64: 1, 2>, scalar_prefetch = 0 : i64, scratch_operands = 3 : i64, tpu.core_type = #tpu.core_type<tc>, window_params = [{}, {transform_indices = @transform_1, window_bounds = array<i64: 1, 128, 128>}, {transform_indices = @transform_2, window_bounds = array<i64: 1, 32, 128>}, {transform_indices = @transform_3, window_bounds = array<i64: 1, 1, 128>}, {transform_indices = @transform_4, window_bounds = array<i64: 1, 8, 32>}, {transform_indices = @transform_5, window_bounds = array<i64: 1, 8, 32>}]} {
    %c0_i32 = arith.constant 0 : i32
    %0 = arith.cmpi eq, %arg1, %c0_i32 : i32
    %1 = arith.extui %0 : i1 to i32
    %c0_i32_0 = arith.constant 0 : i32
    %2 = arith.cmpi ne, %1, %c0_i32_0 : i32
    scf.if %2 {
      %c0_i32_74 = arith.constant 0 : i32
      %c0_i32_75 = arith.constant 0 : i32
      %c0_i32_76 = arith.constant 0 : i32
      %242 = tpu.memref_slice %arg2[%arg0, %c0_i32_74, %c0_i32_75, %c0_i32_76] : memref<1x8x8x128xbf16, #tpu.memory_space<any>> -> memref<1x8x8x128xbf16, #tpu.memory_space<any>>
      %243 = tpu.memref_squeeze %242 : memref<1x8x8x128xbf16, #tpu.memory_space<any>> -> memref<8x8x128xbf16, #tpu.memory_space<any>>
      tpu.enqueue_dma source(%243 : memref<8x8x128xbf16, #tpu.memory_space<any>>) target(%arg8 : memref<8x8x128xbf16, #tpu.memory_space<vmem>>) target_semaphore(%arg10 : memref<!tpu.dma_semaphore, #tpu.memory_space<semaphore_mem>>)
      %c0_i32_77 = arith.constant 0 : i32
      %c0_i32_78 = arith.constant 0 : i32
      %c0_i32_79 = arith.constant 0 : i32
      %244 = tpu.memref_slice %arg2[%arg0, %c0_i32_77, %c0_i32_78, %c0_i32_79] : memref<1x8x8x128xbf16, #tpu.memory_space<any>> -> memref<1x8x8x128xbf16, #tpu.memory_space<any>>
      %245 = tpu.memref_squeeze %244 : memref<1x8x8x128xbf16, #tpu.memory_space<any>> -> memref<8x8x128xbf16, #tpu.memory_space<any>>
      tpu.wait_dma2 semaphore(%arg10 : memref<!tpu.dma_semaphore, #tpu.memory_space<semaphore_mem>>) src(%245 : memref<8x8x128xbf16, #tpu.memory_space<any>>) dst(%arg8 : memref<8x8x128xbf16, #tpu.memory_space<vmem>>)
    } else {
    }
    %c0 = arith.constant 0 : index
    %c0_1 = arith.constant 0 : index
    %c0_2 = arith.constant 0 : index
    %3 = vector.load %arg3[%c0, %c0_1, %c0_2] : memref<1x128x128xbf16, #tpu.memory_space<vmem>>, vector<1x128x128xbf16>
    %4 = vector.shape_cast %3 : vector<1x128x128xbf16> to vector<128x128xbf16>
    %c0_3 = arith.constant 0 : index
    %c0_4 = arith.constant 0 : index
    %c0_5 = arith.constant 0 : index
    %5 = vector.load %arg4[%c0_3, %c0_4, %c0_5] : memref<1x32x128xbf16, #tpu.memory_space<vmem>>, vector<1x32x128xbf16>
    %6 = vector.shape_cast %5 : vector<1x32x128xbf16> to vector<32x128xbf16>
    %c0_6 = arith.constant 0 : index
    %c0_7 = arith.constant 0 : index
    %c0_8 = arith.constant 0 : index
    %7 = vector.load %arg5[%c0_6, %c0_7, %c0_8] : memref<1x1x128xf32, #tpu.memory_space<vmem>>, vector<1x1x128xf32>
    %8 = vector.shape_cast %7 : vector<1x1x128xf32> to vector<1x128xf32>
    %cst = arith.constant 0.000000e+00 : f32
    %9 = vector.broadcast %cst : f32 to vector<8x32xf32>
    %cst_9 = arith.constant 0.000000e+00 : f32
    %10 = vector.broadcast %cst_9 : f32 to vector<8x32xf32>
    %c0_i32_10 = arith.constant 0 : i32
    %c8_i32 = arith.constant 8 : i32
    %11 = arith.muli %c0_i32_10, %c8_i32 : i32
    %12 = arith.index_cast %11 : i32 to index
    %c0_11 = arith.constant 0 : index
    %c0_12 = arith.constant 0 : index
    %13 = vector.load %arg8[%12, %c0_11, %c0_12] : memref<8x8x128xbf16, #tpu.memory_space<vmem>>, vector<8x8x128xbf16>
    %14 = vector.shape_cast %13 : vector<8x8x128xbf16> to vector<64x128xbf16>
    %cst_13 = arith.constant dense<0.000000e+00> : vector<64x128xf32>
    %15 = tpu.matmul %14, %4, %cst_13 {dimension_numbers = #tpu.dot_dimension_numbers<[1], [0], [0], [1], [0, 0, 1, 1], [], []>} : vector<64x128xbf16>, vector<128x128xbf16>, vector<64x128xf32> -> vector<64x128xf32>
    %16 = vector.broadcast %8 : vector<1x128xf32> to vector<64x128xf32>
    %17 = arith.addf %15, %16 : vector<64x128xf32>
    %18 = vector.shape_cast %17 : vector<64x128xf32> to vector<8x8x128xf32>
    %c0_14 = arith.constant 0 : index
    %c0_15 = arith.constant 0 : index
    %c0_16 = arith.constant 0 : index
    %19 = vector.load %arg9[%c0_14, %c0_15, %c0_16] : memref<8x8x128xf32, #tpu.memory_space<vmem>>, vector<8x8x128xf32>
    tpu.vector_store %arg9[%c0_14, %c0_15, %c0_16], %18 {strides = array<i32>} : memref<8x8x128xf32, #tpu.memory_space<vmem>>, vector<8x8x128xf32>,
    %c0_i32_17 = arith.constant 0 : i32
    %20 = arith.index_cast %c0_i32_17 : i32 to index
    %c0_18 = arith.constant 0 : index
    %c0_19 = arith.constant 0 : index
    %21 = vector.load %arg9[%20, %c0_18, %c0_19] : memref<8x8x128xf32, #tpu.memory_space<vmem>>, vector<1x8x128xf32>
    %22 = vector.shape_cast %21 : vector<1x8x128xf32> to vector<8x128xf32>
    %23 = arith.truncf %9 : vector<8x32xf32> to vector<8x32xbf16>
    %cst_20 = arith.constant dense<0.000000e+00> : vector<8x128xf32>
    %24 = tpu.matmul %23, %6, %cst_20 {dimension_numbers = #tpu.dot_dimension_numbers<[1], [0], [0], [1], [0, 0, 1, 1], [], []>} : vector<8x32xbf16>, vector<32x128xbf16>, vector<8x128xf32> -> vector<8x128xf32>
    %25 = arith.addf %22, %24 : vector<8x128xf32>
    %26 = arith.negf %25 : vector<8x128xf32>
    %27 = math.exp %26 : vector<8x128xf32>
    %cst_21 = arith.constant 1.000000e+00 : f32
    %28 = vector.broadcast %cst_21 : f32 to vector<8x128xf32>
    %29 = arith.addf %28, %27 : vector<8x128xf32>
    %30 = arith.divf %28, %29 : vector<8x128xf32>
    %31 = math.tanh %25 : vector<8x128xf32>
    %32 = vector.extract_strided_slice %30 {offsets = [0, 0], sizes = [8, 32], strides = [1, 1]} : vector<8x128xf32> to vector<8x32xf32>
    %33 = vector.extract_strided_slice %30 {offsets = [0, 32], sizes = [8, 32], strides = [1, 1]} : vector<8x128xf32> to vector<8x32xf32>
    %34 = vector.extract_strided_slice %31 {offsets = [0, 64], sizes = [8, 32], strides = [1, 1]} : vector<8x128xf32> to vector<8x32xf32>
    %35 = vector.extract_strided_slice %30 {offsets = [0, 96], sizes = [8, 32], strides = [1, 1]} : vector<8x128xf32> to vector<8x32xf32>
    %36 = arith.mulf %33, %10 : vector<8x32xf32>
    %37 = arith.mulf %32, %34 : vector<8x32xf32>
    %38 = arith.addf %36, %37 : vector<8x32xf32>
    %39 = math.tanh %38 : vector<8x32xf32>
    %40 = arith.mulf %35, %39 : vector<8x32xf32>
    %41 = arith.truncf %40 : vector<8x32xf32> to vector<8x32xbf16>
    %42 = arith.addi %11, %c0_i32_17 : i32
    %43 = arith.index_cast %42 : i32 to index
    %c0_22 = arith.constant 0 : index
    %c0_23 = arith.constant 0 : index
    %44 = vector.load %arg8[%43, %c0_22, %c0_23] : memref<8x8x128xbf16, #tpu.memory_space<vmem>>, vector<1x8x32xbf16>
    %45 = vector.shape_cast %44 : vector<1x8x32xbf16> to vector<8x32xbf16>
    %46 = vector.shape_cast %41 : vector<8x32xbf16> to vector<1x8x32xbf16>
    tpu.vector_store %arg8[%43, %c0_22, %c0_23], %46 {strides = array<i32>} : memref<8x8x128xbf16, #tpu.memory_space<vmem>>, vector<1x8x32xbf16>,
    %c1_i32 = arith.constant 1 : i32
    %47 = arith.index_cast %c1_i32 : i32 to index
    %c0_24 = arith.constant 0 : index
    %c0_25 = arith.constant 0 : index
    %48 = vector.load %arg9[%47, %c0_24, %c0_25] : memref<8x8x128xf32, #tpu.memory_space<vmem>>, vector<1x8x128xf32>
    %49 = vector.shape_cast %48 : vector<1x8x128xf32> to vector<8x128xf32>
    %50 = arith.truncf %40 : vector<8x32xf32> to vector<8x32xbf16>
    %cst_26 = arith.constant dense<0.000000e+00> : vector<8x128xf32>
    %51 = tpu.matmul %50, %6, %cst_26 {dimension_numbers = #tpu.dot_dimension_numbers<[1], [0], [0], [1], [0, 0, 1, 1], [], []>} : vector<8x32xbf16>, vector<32x128xbf16>, vector<8x128xf32> -> vector<8x128xf32>
    %52 = arith.addf %49, %51 : vector<8x128xf32>
    %53 = arith.negf %52 : vector<8x128xf32>
    %54 = math.exp %53 : vector<8x128xf32>
    %cst_27 = arith.constant 1.000000e+00 : f32
    %55 = vector.broadcast %cst_27 : f32 to vector<8x128xf32>
    %56 = arith.addf %55, %54 : vector<8x128xf32>
    %57 = arith.divf %55, %56 : vector<8x128xf32>
    %58 = math.tanh %52 : vector<8x128xf32>
    %59 = vector.extract_strided_slice %57 {offsets = [0, 0], sizes = [8, 32], strides = [1, 1]} : vector<8x128xf32> to vector<8x32xf32>
    %60 = vector.extract_strided_slice %57 {offsets = [0, 32], sizes = [8, 32], strides = [1, 1]} : vector<8x128xf32> to vector<8x32xf32>
    %61 = vector.extract_strided_slice %58 {offsets = [0, 64], sizes = [8, 32], strides = [1, 1]} : vector<8x128xf32> to vector<8x32xf32>
    %62 = vector.extract_strided_slice %57 {offsets = [0, 96], sizes = [8, 32], strides = [1, 1]} : vector<8x128xf32> to vector<8x32xf32>
    %63 = arith.mulf %60, %38 : vector<8x32xf32>
    %64 = arith.mulf %59, %61 : vector<8x32xf32>
    %65 = arith.addf %63, %64 : vector<8x32xf32>
    %66 = math.tanh %65 : vector<8x32xf32>
    %67 = arith.mulf %62, %66 : vector<8x32xf32>
    %68 = arith.truncf %67 : vector<8x32xf32> to vector<8x32xbf16>
    %69 = arith.addi %11, %c1_i32 : i32
    %70 = arith.index_cast %69 : i32 to index
    %c0_28 = arith.constant 0 : index
    %c0_29 = arith.constant 0 : index
    %71 = vector.load %arg8[%70, %c0_28, %c0_29] : memref<8x8x128xbf16, #tpu.memory_space<vmem>>, vector<1x8x32xbf16>
    %72 = vector.shape_cast %71 : vector<1x8x32xbf16> to vector<8x32xbf16>
    %73 = vector.shape_cast %68 : vector<8x32xbf16> to vector<1x8x32xbf16>
    tpu.vector_store %arg8[%70, %c0_28, %c0_29], %73 {strides = array<i32>} : memref<8x8x128xbf16, #tpu.memory_space<vmem>>, vector<1x8x32xbf16>,
    %c2_i32 = arith.constant 2 : i32
    %74 = arith.index_cast %c2_i32 : i32 to index
    %c0_30 = arith.constant 0 : index
    %c0_31 = arith.constant 0 : index
    %75 = vector.load %arg9[%74, %c0_30, %c0_31] : memref<8x8x128xf32, #tpu.memory_space<vmem>>, vector<1x8x128xf32>
    %76 = vector.shape_cast %75 : vector<1x8x128xf32> to vector<8x128xf32>
    %77 = arith.truncf %67 : vector<8x32xf32> to vector<8x32xbf16>
    %cst_32 = arith.constant dense<0.000000e+00> : vector<8x128xf32>
    %78 = tpu.matmul %77, %6, %cst_32 {dimension_numbers = #tpu.dot_dimension_numbers<[1], [0], [0], [1], [0, 0, 1, 1], [], []>} : vector<8x32xbf16>, vector<32x128xbf16>, vector<8x128xf32> -> vector<8x128xf32>
    %79 = arith.addf %76, %78 : vector<8x128xf32>
    %80 = arith.negf %79 : vector<8x128xf32>
    %81 = math.exp %80 : vector<8x128xf32>
    %cst_33 = arith.constant 1.000000e+00 : f32
    %82 = vector.broadcast %cst_33 : f32 to vector<8x128xf32>
    %83 = arith.addf %82, %81 : vector<8x128xf32>
    %84 = arith.divf %82, %83 : vector<8x128xf32>
    %85 = math.tanh %79 : vector<8x128xf32>
    %86 = vector.extract_strided_slice %84 {offsets = [0, 0], sizes = [8, 32], strides = [1, 1]} : vector<8x128xf32> to vector<8x32xf32>
    %87 = vector.extract_strided_slice %84 {offsets = [0, 32], sizes = [8, 32], strides = [1, 1]} : vector<8x128xf32> to vector<8x32xf32>
    %88 = vector.extract_strided_slice %85 {offsets = [0, 64], sizes = [8, 32], strides = [1, 1]} : vector<8x128xf32> to vector<8x32xf32>
    %89 = vector.extract_strided_slice %84 {offsets = [0, 96], sizes = [8, 32], strides = [1, 1]} : vector<8x128xf32> to vector<8x32xf32>
    %90 = arith.mulf %87, %65 : vector<8x32xf32>
    %91 = arith.mulf %86, %88 : vector<8x32xf32>
    %92 = arith.addf %90, %91 : vector<8x32xf32>
    %93 = math.tanh %92 : vector<8x32xf32>
    %94 = arith.mulf %89, %93 : vector<8x32xf32>
    %95 = arith.truncf %94 : vector<8x32xf32> to vector<8x32xbf16>
    %96 = arith.addi %11, %c2_i32 : i32
    %97 = arith.index_cast %96 : i32 to index
    %c0_34 = arith.constant 0 : index
    %c0_35 = arith.constant 0 : index
    %98 = vector.load %arg8[%97, %c0_34, %c0_35] : memref<8x8x128xbf16, #tpu.memory_space<vmem>>, vector<1x8x32xbf16>
    %99 = vector.shape_cast %98 : vector<1x8x32xbf16> to vector<8x32xbf16>
    %100 = vector.shape_cast %95 : vector<8x32xbf16> to vector<1x8x32xbf16>
    tpu.vector_store %arg8[%97, %c0_34, %c0_35], %100 {strides = array<i32>} : memref<8x8x128xbf16, #tpu.memory_space<vmem>>, vector<1x8x32xbf16>,
    %c3_i32 = arith.constant 3 : i32
    %101 = arith.index_cast %c3_i32 : i32 to index
    %c0_36 = arith.constant 0 : index
    %c0_37 = arith.constant 0 : index
    %102 = vector.load %arg9[%101, %c0_36, %c0_37] : memref<8x8x128xf32, #tpu.memory_space<vmem>>, vector<1x8x128xf32>
    %103 = vector.shape_cast %102 : vector<1x8x128xf32> to vector<8x128xf32>
    %104 = arith.truncf %94 : vector<8x32xf32> to vector<8x32xbf16>
    %cst_38 = arith.constant dense<0.000000e+00> : vector<8x128xf32>
    %105 = tpu.matmul %104, %6, %cst_38 {dimension_numbers = #tpu.dot_dimension_numbers<[1], [0], [0], [1], [0, 0, 1, 1], [], []>} : vector<8x32xbf16>, vector<32x128xbf16>, vector<8x128xf32> -> vector<8x128xf32>
    %106 = arith.addf %103, %105 : vector<8x128xf32>
    %107 = arith.negf %106 : vector<8x128xf32>
    %108 = math.exp %107 : vector<8x128xf32>
    %cst_39 = arith.constant 1.000000e+00 : f32
    %109 = vector.broadcast %cst_39 : f32 to vector<8x128xf32>
    %110 = arith.addf %109, %108 : vector<8x128xf32>
    %111 = arith.divf %109, %110 : vector<8x128xf32>
    %112 = math.tanh %106 : vector<8x128xf32>
    %113 = vector.extract_strided_slice %111 {offsets = [0, 0], sizes = [8, 32], strides = [1, 1]} : vector<8x128xf32> to vector<8x32xf32>
    %114 = vector.extract_strided_slice %111 {offsets = [0, 32], sizes = [8, 32], strides = [1, 1]} : vector<8x128xf32> to vector<8x32xf32>
    %115 = vector.extract_strided_slice %112 {offsets = [0, 64], sizes = [8, 32], strides = [1, 1]} : vector<8x128xf32> to vector<8x32xf32>
    %116 = vector.extract_strided_slice %111 {offsets = [0, 96], sizes = [8, 32], strides = [1, 1]} : vector<8x128xf32> to vector<8x32xf32>
    %117 = arith.mulf %114, %92 : vector<8x32xf32>
    %118 = arith.mulf %113, %115 : vector<8x32xf32>
    %119 = arith.addf %117, %118 : vector<8x32xf32>
    %120 = math.tanh %119 : vector<8x32xf32>
    %121 = arith.mulf %116, %120 : vector<8x32xf32>
    %122 = arith.truncf %121 : vector<8x32xf32> to vector<8x32xbf16>
    %123 = arith.addi %11, %c3_i32 : i32
    %124 = arith.index_cast %123 : i32 to index
    %c0_40 = arith.constant 0 : index
    %c0_41 = arith.constant 0 : index
    %125 = vector.load %arg8[%124, %c0_40, %c0_41] : memref<8x8x128xbf16, #tpu.memory_space<vmem>>, vector<1x8x32xbf16>
    %126 = vector.shape_cast %125 : vector<1x8x32xbf16> to vector<8x32xbf16>
    %127 = vector.shape_cast %122 : vector<8x32xbf16> to vector<1x8x32xbf16>
    tpu.vector_store %arg8[%124, %c0_40, %c0_41], %127 {strides = array<i32>} : memref<8x8x128xbf16, #tpu.memory_space<vmem>>, vector<1x8x32xbf16>,
    %c4_i32 = arith.constant 4 : i32
    %128 = arith.index_cast %c4_i32 : i32 to index
    %c0_42 = arith.constant 0 : index
    %c0_43 = arith.constant 0 : index
    %129 = vector.load %arg9[%128, %c0_42, %c0_43] : memref<8x8x128xf32, #tpu.memory_space<vmem>>, vector<1x8x128xf32>
    %130 = vector.shape_cast %129 : vector<1x8x128xf32> to vector<8x128xf32>
    %131 = arith.truncf %121 : vector<8x32xf32> to vector<8x32xbf16>
    %cst_44 = arith.constant dense<0.000000e+00> : vector<8x128xf32>
    %132 = tpu.matmul %131, %6, %cst_44 {dimension_numbers = #tpu.dot_dimension_numbers<[1], [0], [0], [1], [0, 0, 1, 1], [], []>} : vector<8x32xbf16>, vector<32x128xbf16>, vector<8x128xf32> -> vector<8x128xf32>
    %133 = arith.addf %130, %132 : vector<8x128xf32>
    %134 = arith.negf %133 : vector<8x128xf32>
    %135 = math.exp %134 : vector<8x128xf32>
    %cst_45 = arith.constant 1.000000e+00 : f32
    %136 = vector.broadcast %cst_45 : f32 to vector<8x128xf32>
    %137 = arith.addf %136, %135 : vector<8x128xf32>
    %138 = arith.divf %136, %137 : vector<8x128xf32>
    %139 = math.tanh %133 : vector<8x128xf32>
    %140 = vector.extract_strided_slice %138 {offsets = [0, 0], sizes = [8, 32], strides = [1, 1]} : vector<8x128xf32> to vector<8x32xf32>
    %141 = vector.extract_strided_slice %138 {offsets = [0, 32], sizes = [8, 32], strides = [1, 1]} : vector<8x128xf32> to vector<8x32xf32>
    %142 = vector.extract_strided_slice %139 {offsets = [0, 64], sizes = [8, 32], strides = [1, 1]} : vector<8x128xf32> to vector<8x32xf32>
    %143 = vector.extract_strided_slice %138 {offsets = [0, 96], sizes = [8, 32], strides = [1, 1]} : vector<8x128xf32> to vector<8x32xf32>
    %144 = arith.mulf %141, %119 : vector<8x32xf32>
    %145 = arith.mulf %140, %142 : vector<8x32xf32>
    %146 = arith.addf %144, %145 : vector<8x32xf32>
    %147 = math.tanh %146 : vector<8x32xf32>
    %148 = arith.mulf %143, %147 : vector<8x32xf32>
    %149 = arith.truncf %148 : vector<8x32xf32> to vector<8x32xbf16>
    %150 = arith.addi %11, %c4_i32 : i32
    %151 = arith.index_cast %150 : i32 to index
    %c0_46 = arith.constant 0 : index
    %c0_47 = arith.constant 0 : index
    %152 = vector.load %arg8[%151, %c0_46, %c0_47] : memref<8x8x128xbf16, #tpu.memory_space<vmem>>, vector<1x8x32xbf16>
    %153 = vector.shape_cast %152 : vector<1x8x32xbf16> to vector<8x32xbf16>
    %154 = vector.shape_cast %149 : vector<8x32xbf16> to vector<1x8x32xbf16>
    tpu.vector_store %arg8[%151, %c0_46, %c0_47], %154 {strides = array<i32>} : memref<8x8x128xbf16, #tpu.memory_space<vmem>>, vector<1x8x32xbf16>,
    %c5_i32 = arith.constant 5 : i32
    %155 = arith.index_cast %c5_i32 : i32 to index
    %c0_48 = arith.constant 0 : index
    %c0_49 = arith.constant 0 : index
    %156 = vector.load %arg9[%155, %c0_48, %c0_49] : memref<8x8x128xf32, #tpu.memory_space<vmem>>, vector<1x8x128xf32>
    %157 = vector.shape_cast %156 : vector<1x8x128xf32> to vector<8x128xf32>
    %158 = arith.truncf %148 : vector<8x32xf32> to vector<8x32xbf16>
    %cst_50 = arith.constant dense<0.000000e+00> : vector<8x128xf32>
    %159 = tpu.matmul %158, %6, %cst_50 {dimension_numbers = #tpu.dot_dimension_numbers<[1], [0], [0], [1], [0, 0, 1, 1], [], []>} : vector<8x32xbf16>, vector<32x128xbf16>, vector<8x128xf32> -> vector<8x128xf32>
    %160 = arith.addf %157, %159 : vector<8x128xf32>
    %161 = arith.negf %160 : vector<8x128xf32>
    %162 = math.exp %161 : vector<8x128xf32>
    %cst_51 = arith.constant 1.000000e+00 : f32
    %163 = vector.broadcast %cst_51 : f32 to vector<8x128xf32>
    %164 = arith.addf %163, %162 : vector<8x128xf32>
    %165 = arith.divf %163, %164 : vector<8x128xf32>
    %166 = math.tanh %160 : vector<8x128xf32>
    %167 = vector.extract_strided_slice %165 {offsets = [0, 0], sizes = [8, 32], strides = [1, 1]} : vector<8x128xf32> to vector<8x32xf32>
    %168 = vector.extract_strided_slice %165 {offsets = [0, 32], sizes = [8, 32], strides = [1, 1]} : vector<8x128xf32> to vector<8x32xf32>
    %169 = vector.extract_strided_slice %166 {offsets = [0, 64], sizes = [8, 32], strides = [1, 1]} : vector<8x128xf32> to vector<8x32xf32>
    %170 = vector.extract_strided_slice %165 {offsets = [0, 96], sizes = [8, 32], strides = [1, 1]} : vector<8x128xf32> to vector<8x32xf32>
    %171 = arith.mulf %168, %146 : vector<8x32xf32>
    %172 = arith.mulf %167, %169 : vector<8x32xf32>
    %173 = arith.addf %171, %172 : vector<8x32xf32>
    %174 = math.tanh %173 : vector<8x32xf32>
    %175 = arith.mulf %170, %174 : vector<8x32xf32>
    %176 = arith.truncf %175 : vector<8x32xf32> to vector<8x32xbf16>
    %177 = arith.addi %11, %c5_i32 : i32
    %178 = arith.index_cast %177 : i32 to index
    %c0_52 = arith.constant 0 : index
    %c0_53 = arith.constant 0 : index
    %179 = vector.load %arg8[%178, %c0_52, %c0_53] : memref<8x8x128xbf16, #tpu.memory_space<vmem>>, vector<1x8x32xbf16>
    %180 = vector.shape_cast %179 : vector<1x8x32xbf16> to vector<8x32xbf16>
    %181 = vector.shape_cast %176 : vector<8x32xbf16> to vector<1x8x32xbf16>
    tpu.vector_store %arg8[%178, %c0_52, %c0_53], %181 {strides = array<i32>} : memref<8x8x128xbf16, #tpu.memory_space<vmem>>, vector<1x8x32xbf16>,
    %c6_i32 = arith.constant 6 : i32
    %182 = arith.index_cast %c6_i32 : i32 to index
    %c0_54 = arith.constant 0 : index
    %c0_55 = arith.constant 0 : index
    %183 = vector.load %arg9[%182, %c0_54, %c0_55] : memref<8x8x128xf32, #tpu.memory_space<vmem>>, vector<1x8x128xf32>
    %184 = vector.shape_cast %183 : vector<1x8x128xf32> to vector<8x128xf32>
    %185 = arith.truncf %175 : vector<8x32xf32> to vector<8x32xbf16>
    %cst_56 = arith.constant dense<0.000000e+00> : vector<8x128xf32>
    %186 = tpu.matmul %185, %6, %cst_56 {dimension_numbers = #tpu.dot_dimension_numbers<[1], [0], [0], [1], [0, 0, 1, 1], [], []>} : vector<8x32xbf16>, vector<32x128xbf16>, vector<8x128xf32> -> vector<8x128xf32>
    %187 = arith.addf %184, %186 : vector<8x128xf32>
    %188 = arith.negf %187 : vector<8x128xf32>
    %189 = math.exp %188 : vector<8x128xf32>
    %cst_57 = arith.constant 1.000000e+00 : f32
    %190 = vector.broadcast %cst_57 : f32 to vector<8x128xf32>
    %191 = arith.addf %190, %189 : vector<8x128xf32>
    %192 = arith.divf %190, %191 : vector<8x128xf32>
    %193 = math.tanh %187 : vector<8x128xf32>
    %194 = vector.extract_strided_slice %192 {offsets = [0, 0], sizes = [8, 32], strides = [1, 1]} : vector<8x128xf32> to vector<8x32xf32>
    %195 = vector.extract_strided_slice %192 {offsets = [0, 32], sizes = [8, 32], strides = [1, 1]} : vector<8x128xf32> to vector<8x32xf32>
    %196 = vector.extract_strided_slice %193 {offsets = [0, 64], sizes = [8, 32], strides = [1, 1]} : vector<8x128xf32> to vector<8x32xf32>
    %197 = vector.extract_strided_slice %192 {offsets = [0, 96], sizes = [8, 32], strides = [1, 1]} : vector<8x128xf32> to vector<8x32xf32>
    %198 = arith.mulf %195, %173 : vector<8x32xf32>
    %199 = arith.mulf %194, %196 : vector<8x32xf32>
    %200 = arith.addf %198, %199 : vector<8x32xf32>
    %201 = math.tanh %200 : vector<8x32xf32>
    %202 = arith.mulf %197, %201 : vector<8x32xf32>
    %203 = arith.truncf %202 : vector<8x32xf32> to vector<8x32xbf16>
    %204 = arith.addi %11, %c6_i32 : i32
    %205 = arith.index_cast %204 : i32 to index
    %c0_58 = arith.constant 0 : index
    %c0_59 = arith.constant 0 : index
    %206 = vector.load %arg8[%205, %c0_58, %c0_59] : memref<8x8x128xbf16, #tpu.memory_space<vmem>>, vector<1x8x32xbf16>
    %207 = vector.shape_cast %206 : vector<1x8x32xbf16> to vector<8x32xbf16>
    %208 = vector.shape_cast %203 : vector<8x32xbf16> to vector<1x8x32xbf16>
    tpu.vector_store %arg8[%205, %c0_58, %c0_59], %208 {strides = array<i32>} : memref<8x8x128xbf16, #tpu.memory_space<vmem>>, vector<1x8x32xbf16>,
    %c7_i32 = arith.constant 7 : i32
    %209 = arith.index_cast %c7_i32 : i32 to index
    %c0_60 = arith.constant 0 : index
    %c0_61 = arith.constant 0 : index
    %210 = vector.load %arg9[%209, %c0_60, %c0_61] : memref<8x8x128xf32, #tpu.memory_space<vmem>>, vector<1x8x128xf32>
    %211 = vector.shape_cast %210 : vector<1x8x128xf32> to vector<8x128xf32>
    %212 = arith.truncf %202 : vector<8x32xf32> to vector<8x32xbf16>
    %cst_62 = arith.constant dense<0.000000e+00> : vector<8x128xf32>
    %213 = tpu.matmul %212, %6, %cst_62 {dimension_numbers = #tpu.dot_dimension_numbers<[1], [0], [0], [1], [0, 0, 1, 1], [], []>} : vector<8x32xbf16>, vector<32x128xbf16>, vector<8x128xf32> -> vector<8x128xf32>
    %214 = arith.addf %211, %213 : vector<8x128xf32>
    %215 = arith.negf %214 : vector<8x128xf32>
    %216 = math.exp %215 : vector<8x128xf32>
    %cst_63 = arith.constant 1.000000e+00 : f32
    %217 = vector.broadcast %cst_63 : f32 to vector<8x128xf32>
    %218 = arith.addf %217, %216 : vector<8x128xf32>
    %219 = arith.divf %217, %218 : vector<8x128xf32>
    %220 = math.tanh %214 : vector<8x128xf32>
    %221 = vector.extract_strided_slice %219 {offsets = [0, 0], sizes = [8, 32], strides = [1, 1]} : vector<8x128xf32> to vector<8x32xf32>
    %222 = vector.extract_strided_slice %219 {offsets = [0, 32], sizes = [8, 32], strides = [1, 1]} : vector<8x128xf32> to vector<8x32xf32>
    %223 = vector.extract_strided_slice %220 {offsets = [0, 64], sizes = [8, 32], strides = [1, 1]} : vector<8x128xf32> to vector<8x32xf32>
    %224 = vector.extract_strided_slice %219 {offsets = [0, 96], sizes = [8, 32], strides = [1, 1]} : vector<8x128xf32> to vector<8x32xf32>
    %225 = arith.mulf %222, %200 : vector<8x32xf32>
    %226 = arith.mulf %221, %223 : vector<8x32xf32>
    %227 = arith.addf %225, %226 : vector<8x32xf32>
    %228 = math.tanh %227 : vector<8x32xf32>
    %229 = arith.mulf %224, %228 : vector<8x32xf32>
    %230 = arith.truncf %229 : vector<8x32xf32> to vector<8x32xbf16>
    %231 = arith.addi %11, %c7_i32 : i32
    %232 = arith.index_cast %231 : i32 to index
    %c0_64 = arith.constant 0 : index
    %c0_65 = arith.constant 0 : index
    %233 = vector.load %arg8[%232, %c0_64, %c0_65] : memref<8x8x128xbf16, #tpu.memory_space<vmem>>, vector<1x8x32xbf16>
    %234 = vector.shape_cast %233 : vector<1x8x32xbf16> to vector<8x32xbf16>
    %235 = vector.shape_cast %230 : vector<8x32xbf16> to vector<1x8x32xbf16>
    tpu.vector_store %arg8[%232, %c0_64, %c0_65], %235 {strides = array<i32>} : memref<8x8x128xbf16, #tpu.memory_space<vmem>>, vector<1x8x32xbf16>,
    %c8_i32_66 = arith.constant 8 : i32
    %c1_i32_67 = arith.constant 1 : i32
    %c0_68 = arith.constant 0 : index
    %c0_69 = arith.constant 0 : index
    %c0_70 = arith.constant 0 : index
    %236 = vector.load %arg6[%c0_68, %c0_69, %c0_70] : memref<1x8x32xf32, #tpu.memory_space<vmem>>, vector<1x8x32xf32>
    %237 = vector.shape_cast %236 : vector<1x8x32xf32> to vector<8x32xf32>
    %238 = vector.shape_cast %229 : vector<8x32xf32> to vector<1x8x32xf32>
    tpu.vector_store %arg6[%c0_68, %c0_69, %c0_70], %238 {strides = array<i32>} : memref<1x8x32xf32, #tpu.memory_space<vmem>>, vector<1x8x32xf32>,
    %c0_71 = arith.constant 0 : index
    %c0_72 = arith.constant 0 : index
    %c0_73 = arith.constant 0 : index
    %239 = vector.load %arg7[%c0_71, %c0_72, %c0_73] : memref<1x8x32xf32, #tpu.memory_space<vmem>>, vector<1x8x32xf32>
    %240 = vector.shape_cast %239 : vector<1x8x32xf32> to vector<8x32xf32>
    %241 = vector.shape_cast %227 : vector<8x32xf32> to vector<1x8x32xf32>
    tpu.vector_store %arg7[%c0_71, %c0_72, %c0_73], %241 {strides = array<i32>} : memref<1x8x32xf32, #tpu.memory_space<vmem>>, vector<1x8x32xf32>,
    return
  }
  func.func @transform_1(%arg0: i32, %arg1: i32) -> (i32, i32, i32) {
    %c0_i32 = arith.constant 0 : i32
    %c0_i32_0 = arith.constant 0 : i32
    %c0_i32_1 = arith.constant 0 : i32
    return %arg1, %c0_i32, %c0_i32_0 : i32, i32, i32
  }
  func.func @transform_2(%arg0: i32, %arg1: i32) -> (i32, i32, i32) {
    %c0_i32 = arith.constant 0 : i32
    %c0_i32_0 = arith.constant 0 : i32
    %c0_i32_1 = arith.constant 0 : i32
    return %arg1, %c0_i32, %c0_i32_0 : i32, i32, i32
  }
  func.func @transform_3(%arg0: i32, %arg1: i32) -> (i32, i32, i32) {
    %c0_i32 = arith.constant 0 : i32
    %c0_i32_0 = arith.constant 0 : i32
    %c0_i32_1 = arith.constant 0 : i32
    return %arg1, %c0_i32, %c0_i32_0 : i32, i32, i32
  }
  func.func @transform_4(%arg0: i32, %arg1: i32) -> (i32, i32, i32) {
    %c0_i32 = arith.constant 0 : i32
    %c0_i32_0 = arith.constant 0 : i32
    return %arg1, %arg0, %c0_i32 : i32, i32, i32
  }
  func.func @transform_5(%arg0: i32, %arg1: i32) -> (i32, i32, i32) {
    %c0_i32 = arith.constant 0 : i32
    %c0_i32_0 = arith.constant 0 : i32
    return %arg1, %arg0, %c0_i32 : i32, i32, i32
  }
}

</mosaic_0001>

<bundles_post_ra>
// kernel: lstm_encoder_forward.1
= control target key start
LH: loop header
LB: loop body
LE: loop exit
PB: predicated region body
PF: predicated region fallthrough
CT: control target
= control target key end

     0   :  { %s1685_s18 = smov 0   ;;  %s1687_s19 = smov 0   ;;  %s1925_s0 = inlined_call_operand.vmem [shape: bf16[1,8,8,128], index: 0, kind: input, shape index: {}]   ;;  %s1926_s1 = inlined_call_operand.vmem [shape: bf16[2,128,128], index: 1, kind: input, shape index: {}]   ;;  %s1927_s2 = inlined_call_operand.vmem [shape: bf16[2,32,128], index: 2, kind: input, shape index: {}]   ;;  %s1928_s3 = inlined_call_operand.vmem [shape: f32[2,1,128], index: 3, kind: input, shape index: {}]   ;;  %s1929_s4 = inlined_call_operand.vmem [shape: f32[2,8,32], index: 4, kind: output, shape index: {0}]   ;;  %s1930_s5 = inlined_call_operand.vmem [shape: f32[2,8,32], index: 5, kind: output, shape index: {1}]  }
   0x1   :  { %s1689_s20 = smov 0  }
   0x2 LB: > { %s25_s21 = sadd.s32 1, %s1643_s19  ;;  %p1332_p0 = scmp.ge.s32.totalorder %s1647_s20, 1  ;;  %s1647_s20 = sphi %s1689_s20, %s16_s20   ;;  %s1643_s19 = sphi %s1687_s19, %s1932_s19   ;;  %s1639_s18 = sphi %s1685_s18, %s1931_s18  }
   0x3   : > { %p26_p1 = scmp.ge.s32.totalorder %s25_s21, 2  ;;  %p200_p2 = scmp.lt.s32.totalorder %s1647_s20, 3 }
   0x5   : > { %s1934_s21 = smov (%p26_p1, %s25_s21), 0  ;;  %p201_p3 = pnand %p1332_p0, %p200_p2 }
   0x6   : > { %p243_p4 = scmp.lt.s32.totalorder (!%p201_p3), %s1639_s18, 1  ;;  %p1339_p5 = scmp.ne.s32.totalorder (!%p201_p3), %s1639_s18, 0 }
   0x7   : > { %204 = sbr.rel (%p201_p3) target bundleno = 5698 (0x1642), region = 32 }
   0xe   : > { %s1703_s22 = scalar_select %p243_p4, %s1639_s18, 1 }
   0xf   : > { %274 = sbr.rel (%p1339_p5) target bundleno = 25 (0x19), region = 36  ;;  %v310_v0 = vld [vmem:[%s1925_s0] sm:$0xff] (!%p1339_p5)  ;;  %v312_v1 = vld [vmem:[%s1925_s0 + $0x8] sm:$0xff] (!%p1339_p5)  ;;  %v314_v2 = vld [vmem:[%s1925_s0 + $0x10] sm:$0xff] (!%p1339_p5) }
  0x10   : > { %s1381_s23 = sshll.u32 %s1703_s22, 6  ;;  %s1382_s24 = sshll.u32 %s1703_s22, 4  ;;  %311 = vst [vmem:[#allocation2] sm:$0xff] (!%p1339_p5), %v310_v0  ;;  %313 = vst [vmem:[#allocation2 + $0x8] sm:$0xff] (!%p1339_p5), %v312_v1  ;;  %v316_v3 = vld [vmem:[%s1925_s0 + $0x18] sm:$0xff] (!%p1339_p5) }
  0x11   : > { %s1710_s27 = scalar_lea.vmem %s1926_s1, %s1381_s23  ;;  %s1715_s30 = scalar_lea.vmem %s1927_s2, %s1382_s24  ;;  %315 = vst [vmem:[#allocation2 + $0x10] sm:$0xff] (!%p1339_p5), %v314_v2  ;;  %317 = vst [vmem:[#allocation2 + $0x18] sm:$0xff] (!%p1339_p5), %v316_v3 }
  0x12   : > { %s255_s8 = scalar_lea.vmem %s1928_s3, %s1703_s22  ;;  %s1337_s9 = sshll.u32 %s1703_s22, 3 }
  0x13   : > { %s1725_s12 = scalar_lea.vmem %s1929_s4, %s1337_s9  ;;  %s1730_s15 = scalar_lea.vmem %s1930_s5, %s1337_s9 }
  0x16   : > { %325 = vsyncadd [#allocation4], 512 }
  0x17   : > { %1635 = dma.done.wait [#allocation4], 512 }
  0x18   : > { %1636 = vsyncadd [#allocation4], 4294966784 }
  0x19 PF: > { %v1545_v4 = vld [vmem:[%s1710_s27] sm:$0xff]   ;;  %v1546_v5 = vld [vmem:[%s1710_s27 + $0x8] sm:$0xff]   ;;  %v1649_v6 = vmov 0.0   ;;  %vm1650_vm0 = vmmov 0   ;;  %v1547_v7 = vld [vmem:[%s1710_s27 + $0x10] sm:$0xff]   ;;  %v1651_v14 = vmov 0  }
  0x1a   : > { %1451 = vmatprep.subr.bf16.mxu1 %v1649_v6  ;;  %1427 = vmatprep.subr.bf16.mxu0 %v1545_v4  ;;  %v1751_v8 = vld [vmem:[%s1715_s30] sm:$0xff]   ;;  %v1548_v9 = vld [vmem:[%s1710_s27 + $0x18] sm:$0xff]   ;;  %v1756_v10 = vld [vmem:[%s1715_s30 + $0x8] sm:$0xff]   ;;  %s1652_s30 = smov 64   ;;  %s1653_s22 = smov 32   ;;  %vm524_vm1 = vcmask 261120  }
  0x1b   : > { %1455 = vmatprep.mubr.msk.bf16.mxu1 %vm1650_vm0, %v1649_v6  ;;  %1428 = vmatpush3.bf16.msra.mxu0 %v1545_v4  ;;  %v1555_v11 = vld [vmem:[#allocation2] sm:$0xff]   ;;  %v1550_v13 = vld [vmem:[%s1710_s27 + $0x28] sm:$0xff]   ;;  %v1551_v15 = vld [vmem:[%s1710_s27 + $0x30] sm:$0xff]   ;;  %vm600_vm2 = vcmask 257024   ;;  %s1654_s6 = smov 96  }
  0x1c   : > { %1429 = vmatprep.subr.bf16.mxu0 %v1546_v5  ;;  %1452 = vmatpush3.bf16.msra.mxu1 %v1751_v8  ;;  %v1549_v12 = vld [vmem:[%s1710_s27 + $0x20] sm:$0xff]   ;;  %v1553_v16 = vld [vmem:[%s1710_s27 + $0x38] sm:$0xff]   ;;  %v1556_v17 = vld [vmem:[#allocation2 + $0x8] sm:$0xff]  }
  0x1d   : > { %1453 = vmatprep.subr.bf16.mxu1 %v1649_v6  ;;  %1443 = vmatprep.mubr.bf16.mxu0 %v1555_v11  ;;  %v1781_v22 = vld [vmem:[%s255_s8] ss:$0 sm:$0xff] }
  0x1f   : > { %1430 = vmatpush3.bf16.msra.mxu0 %v1546_v5 }
  0x20   : > { %1431 = vmatprep.subr.bf16.mxu0 %v1547_v7  ;;  %1454 = vmatpush3.bf16.msra.mxu1 %v1756_v10 }
  0x21   : > { %1459 = vmatprep.subr.bf16.mxu1 %v1649_v6 }
  0x23   : > { %1432 = vmatpush3.bf16.msra.mxu0 %v1547_v7  ;;  %1456 = vmatmul.mubr.bf16.vlgmr.msra.gmra.mrb[0].mxu1 %v1651_v14 }
  0x24   : > { %1433 = vmatprep.subr.bf16.mxu0 %v1548_v9  ;;  %1460 = vmatpush3.bf16.msra.mxu1 %v1751_v8 }
  0x25   : > { %1463 = vmatprep.mubr.msk.bf16.mxu1 %vm1650_vm0, %v1649_v6  ;;  %1461 = vmatprep.subr.bf16.mxu1 %v1649_v6 }
  0x27   : > { %1434 = vmatpush3.bf16.msra.mxu0 %v1548_v9 }
  0x28   : > { %1435 = vmatprep.subr.bf16.mxu0 %v1549_v12  ;;  %1462 = vmatpush3.bf16.msra.mxu1 %v1756_v10 }
  0x29   : > { %1467 = vmatprep.subr.bf16.mxu1 %v1649_v6 }
  0x2b   : > { %1436 = vmatpush3.bf16.msra.mxu0 %v1549_v12 }
  0x2c   : > { %1437 = vmatprep.subr.bf16.mxu0 %v1550_v13 }
  0x2f   : > { %1438 = vmatpush3.bf16.msra.mxu0 %v1550_v13 }
  0x30   : > { %1439 = vmatprep.subr.bf16.mxu0 %v1551_v15 }
  0x33   : > { %1440 = vmatpush3.bf16.msra.mxu0 %v1551_v15 }
  0x34   : > { %1441 = vmatprep.subr.bf16.mxu0 %v1553_v16 }
  0x37   : > { %1442 = vmatpush3.bf16.msra.mxu0 %v1553_v16 }
  0x38   : > { %1491 = vmatprep.subr.bf16.mxu0 %v1649_v6 }
  0x3a   : > { %1444 = vmatmul.mubr.bf16.vlgmr.msra.gmra.mrb[0].mxu0 %v1556_v17 }
  0x3b   : > { %1492 = vmatpush3.bf16.msra.mxu0 %v1751_v8 }
  0x3c   : > { %1493 = vmatprep.subr.bf16.mxu0 %v1649_v6 }
  0x3f   : > { %1494 = vmatpush3.bf16.msra.mxu0 %v1756_v10 }
  0x40   : > { %1507 = vmatprep.subr.bf16.mxu0 %v1649_v6 }
  0xf6   : > { %v562_v18 = vpop.f32.mrb[0].mxu1 }
  0xf7   : > { %v1457_v19 = vpop.f32.mrb[1].mxu1 }
  0xf8   : > { %v565_v20 = vpop.f32.mrb[2].mxu1 }
  0xf9   : > { %v1458_v21 = vpop.f32.mrb[3].mxu1 }
 0x10d   : > { %v1783_v23 = vpop.f32.mrb[0].mxu0 }
 0x10e   : > { %v472_v24 = vpop.f32.mrb[1].mxu0  ;;  %v481_v1 = vadd.f32 %v1783_v23, %v1781_v22 }
 0x10f   : > { %v473_v25 = vadd.f32 %v1781_v22, %v472_v24  ;;  %v1786_v26 = vpop.f32.mrb[2].mxu0 }
 0x110   : > { %v475_v27 = vpop.f32.mrb[3].mxu0 }
 0x111   : > { %v568_v28 = vadd.f32 %v562_v18, %v473_v25  ;;  %v476_v44 = vadd.f32 %v1781_v22, %v475_v27  ;;  %v484_v27 = vadd.f32 %v1786_v26, %v1781_v22 }
 0x113   : > { %1559 = vtanh.f32 %v568_v28  ;;  %v1355_v30 = vmul.f32 -1.442695, %v568_v28 }
 0x115   : > { %1561 = vpow2.f32 %v1355_v30 }
 0x11d   : > { %v1560_v29 = vpop.eup %1559 }
 0x11e   : > { %578 = vrot.lane.b32.xlu0 %v1560_v29, %s1652_s30 }
 0x11f   : > { %v1562_v31 = vpop.eup %1561 }
 0x120   : > { %v572_v32 = vadd.f32 1.0, %v1562_v31 }
 0x122   : > { %1563 = vrcp.f32 %v572_v32 }
 0x12c   : > { %v1564_v33 = vpop.eup %1563 }
 0x12d   : > { %v576_v36 = vmul.f32 0.0, %v1564_v33 }
 0x190   : > { %v579_v34 = vpop.permute.xlu0 %578 }
 0x191   : > { %v581_v35 = vmul.f32 %v1564_v33, %v579_v34 }
 0x193   : > { %583 = vrot.lane.b32.xlu0 %v581_v35, %s1653_s22 }
 0x205   : > { %v584_v37 = vpop.permute.xlu0 %583 }
 0x206   : > { %v586_v38 = vadd.f32 %v584_v37, %v576_v36 }
 0x208   : > { %1565 = vtanh.f32 %v586_v38 }
 0x212   : > { %v1566_v39 = vpop.eup %1565 }
 0x213   : > { %589 = vrot.lane.b32.xlu1 %v1566_v39, %s1652_s30 }
 0x285   : > { %v590_v40 = vpop.permute.xlu1 %589 }
 0x286   : > { %v592_v41 = vmul.f32 %v1564_v33, %v590_v40 }
 0x288   : > { %v1791_v42 = vpack.c.bf16 %v592_v41, %v592_v41 }
 0x28a   : > { %604 = vrot.lane.b32.xlu1 %v1791_v42, %s1653_s22 }
 0x2fc   : > { %v605_v43 = vpop.permute.xlu1 %604 }
 0x2fd   : > { %1464 = vmatmul.mubr.msk.bf16.vlgmr.msra.gmra.mrb[4].mxu1 %vm524_vm1, %v605_v43  ;;  %v1557_v43 = vld [vmem:[#allocation2 + $0x10] sm:$0xff]  }
 0x2fe   : > { %1468 = vmatpush3.bf16.msra.mxu1 %v1751_v8  ;;  %1471 = vmatprep.mubr.msk.bf16.mxu1 %vm1650_vm0, %v1649_v6 }
 0x2ff   : > { %1469 = vmatprep.subr.bf16.mxu1 %v1649_v6  ;;  %1447 = vmatprep.mubr.bf16.mxu0 %v1557_v43 }
 0x302   : > { %1470 = vmatpush3.bf16.msra.mxu1 %v1756_v10 }
 0x303   : > { %1475 = vmatprep.subr.bf16.mxu1 %v1649_v6 }
 0x3d0   : > { %v643_v45 = vpop.f32.mrb[4].mxu1 }
 0x3d1   : > { %v649_v46 = vadd.f32 %v643_v45, %v476_v44  ;;  %v1465_v47 = vpop.f32.mrb[5].mxu1  ;;  %v1558_v44 = vld [vmem:[#allocation2 + $0x18] sm:$0xff]  }
 0x3d2   : > { %v646_v48 = vpop.f32.mrb[6].mxu1  ;;  %1448 = vmatmul.mubr.bf16.gmra.mrb[4].mxu0 %v1558_v44 }
 0x3d3   : > { %1567 = vtanh.f32 %v649_v46  ;;  %v1466_v49 = vpop.f32.mrb[7].mxu1  ;;  %v1358_v51 = vmul.f32 -1.442695, %v649_v46  ;;  %1495 = vmatprep.mubr.msk.bf16.mxu0 %vm1650_vm0, %v1649_v6 }
 0x3d5   : > { %1569 = vpow2.f32 %v1358_v51 }
 0x3dd   : > { %v1568_v50 = vpop.eup %1567 }
 0x3de   : > { %659 = vrot.lane.b32.xlu0 %v1568_v50, %s1652_s30 }
 0x3df   : > { %v1570_v52 = vpop.eup %1569 }
 0x3e0   : > { %v653_v53 = vadd.f32 1.0, %v1570_v52 }
 0x3e2   : > { %1571 = vrcp.f32 %v653_v53 }
 0x3ec   : > { %v1572_v54 = vpop.eup %1571 }
 0x3ed   : > { %v657_v57 = vmul.f32 %v1572_v54, %v586_v38 }
 0x450   : > { %v660_v55 = vpop.permute.xlu0 %659 }
 0x451   : > { %v662_v56 = vmul.f32 %v1572_v54, %v660_v55 }
 0x453   : > { %664 = vrot.lane.b32.xlu1 %v662_v56, %s1653_s22 }
 0x4a5   : > { %v1844_v49 = vpop.f32.mrb[4].mxu0 }
 0x4a6   : > { %v488_v50 = vpop.f32.mrb[5].mxu0 }
 0x4a7   : > { %v1846_v51 = vpop.f32.mrb[6].mxu0 }
 0x4a8   : > { %v491_v52 = vpop.f32.mrb[7].mxu0 }
 0x4c5   : > { %v665_v58 = vpop.permute.xlu1 %664 }
 0x4c6   : > { %v667_v59 = vadd.f32 %v665_v58, %v657_v57 }
 0x4c8   : > { %1573 = vtanh.f32 %v667_v59 }
 0x4d2   : > { %v1574_v60 = vpop.eup %1573 }
 0x4d3   : > { %670 = vrot.lane.b32.xlu0 %v1574_v60, %s1652_s30 }
 0x545   : > { %v671_v61 = vpop.permute.xlu0 %670 }
 0x546   : > { %v673_v62 = vmul.f32 %v1572_v54, %v671_v61  ;;  %v489_v54 = vadd.f32 %v1781_v22, %v488_v50 }
 0x548   : > { %v1806_v63 = vpack.c.bf16 %v673_v62, %v673_v62 }
 0x54a   : > { %685 = vrot.lane.b32.xlu1 %v1806_v63, %s1653_s22 }
 0x5bc   : > { %v686_v0 = vpop.permute.xlu1 %685 }
 0x5bd   : > { %1472 = vmatmul.mubr.msk.bf16.vlgmr.msra.gmra.mrb[8].mxu1 %vm524_vm1, %v686_v0 }
 0x5be   : > { %1476 = vmatpush3.bf16.msra.mxu1 %v1751_v8  ;;  %1479 = vmatprep.mubr.msk.bf16.mxu1 %vm1650_vm0, %v1649_v6 }
 0x5bf   : > { %1477 = vmatprep.subr.bf16.mxu1 %v1649_v6 }
 0x5c2   : > { %1478 = vmatpush3.bf16.msra.mxu1 %v1756_v10 }
 0x5c3   : > { %1483 = vmatprep.subr.bf16.mxu1 %v1649_v6 }
 0x690   : > { %v724_v2 = vpop.f32.mrb[8].mxu1 }
 0x691   : > { %v730_v3 = vadd.f32 %v724_v2, %v481_v1  ;;  %v1473_v4 = vpop.f32.mrb[9].mxu1 }
 0x692   : > { %v727_v5 = vpop.f32.mrb[10].mxu1 }
 0x693   : > { %1575 = vtanh.f32 %v730_v3  ;;  %v1474_v7 = vpop.f32.mrb[11].mxu1  ;;  %v1361_v11 = vmul.f32 -1.442695, %v730_v3 }
 0x695   : > { %1577 = vpow2.f32 %v1361_v11 }
 0x69d   : > { %v1576_v9 = vpop.eup %1575 }
 0x69e   : > { %740 = vrot.lane.b32.xlu0 %v1576_v9, %s1652_s30 }
 0x69f   : > { %v1578_v12 = vpop.eup %1577 }
 0x6a0   : > { %v734_v13 = vadd.f32 1.0, %v1578_v12 }
 0x6a2   : > { %1579 = vrcp.f32 %v734_v13 }
 0x6ac   : > { %v1580_v14 = vpop.eup %1579 }
 0x6ad   : > { %v738_v17 = vmul.f32 %v1580_v14, %v667_v59 }
 0x710   : > { %v741_v15 = vpop.permute.xlu0 %740 }
 0x711   : > { %v743_v16 = vmul.f32 %v1580_v14, %v741_v15  ;;  %v492_v15 = vadd.f32 %v1781_v22, %v491_v52 }
 0x713   : > { %745 = vrot.lane.b32.xlu1 %v743_v16, %s1653_s22 }
 0x785   : > { %v746_v18 = vpop.permute.xlu1 %745 }
 0x786   : > { %v748_v19 = vadd.f32 %v746_v18, %v738_v17 }
 0x788   : > { %1581 = vtanh.f32 %v748_v19 }
 0x792   : > { %v1582_v20 = vpop.eup %1581 }
 0x793   : > { %751 = vrot.lane.b32.xlu0 %v1582_v20, %s1652_s30 }
 0x805   : > { %v752_v21 = vpop.permute.xlu0 %751 }
 0x806   : > { %v754_v23 = vmul.f32 %v1580_v14, %v752_v21 }
 0x808   : > { %v1822_v24 = vpack.c.bf16 %v754_v23, %v754_v23 }
 0x80a   : > { %766 = vrot.lane.b32.xlu1 %v1822_v24, %s1653_s22 }
 0x87c   : > { %v767_v25 = vpop.permute.xlu1 %766 }
 0x87d   : > { %1480 = vmatmul.mubr.msk.bf16.vlgmr.msra.gmra.mrb[12].mxu1 %vm524_vm1, %v767_v25 }
 0x87e   : > { %1484 = vmatpush3.bf16.msra.mxu1 %v1751_v8  ;;  %1487 = vmatprep.mubr.msk.bf16.mxu1 %vm1650_vm0, %v1649_v6 }
 0x87f   : > { %1485 = vmatprep.subr.bf16.mxu1 %v1649_v6 }
 0x882   : > { %1486 = vmatpush3.bf16.msra.mxu1 %v1756_v10 }
 0x883   : > { %1499 = vmatprep.subr.bf16.mxu1 %v1649_v6 }
 0x950   : > { %v805_v28 = vpop.f32.mrb[12].mxu1 }
 0x951   : > { %v811_v29 = vadd.f32 %v805_v28, %v484_v27  ;;  %v1481_v30 = vpop.f32.mrb[13].mxu1 }
 0x952   : > { %v808_v31 = vpop.f32.mrb[14].mxu1 }
 0x953   : > { %1583 = vtanh.f32 %v811_v29  ;;  %v1482_v32 = vpop.f32.mrb[15].mxu1  ;;  %v1364_v34 = vmul.f32 -1.442695, %v811_v29 }
 0x955   : > { %1585 = vpow2.f32 %v1364_v34 }
 0x95d   : > { %v1584_v33 = vpop.eup %1583 }
 0x95e   : > { %821 = vrot.lane.b32.xlu0 %v1584_v33, %s1652_s30 }
 0x95f   : > { %v1586_v35 = vpop.eup %1585 }
 0x960   : > { %v815_v36 = vadd.f32 1.0, %v1586_v35 }
 0x962   : > { %1587 = vrcp.f32 %v815_v36  ;;  %v497_v36 = vadd.f32 %v1844_v49, %v1781_v22 }
 0x96c   : > { %v1588_v37 = vpop.eup %1587 }
 0x96d   : > { %v819_v26 = vmul.f32 %v1588_v37, %v748_v19 }
 0x9d0   : > { %v822_v38 = vpop.permute.xlu0 %821 }
 0x9d1   : > { %v824_v39 = vmul.f32 %v1588_v37, %v822_v38 }
 0x9d3   : > { %826 = vrot.lane.b32.xlu1 %v824_v39, %s1653_s22 }
 0xa45   : > { %v827_v40 = vpop.permute.xlu1 %826 }
 0xa46   : > { %v829_v41 = vadd.f32 %v827_v40, %v819_v26 }
 0xa48   : > { %1589 = vtanh.f32 %v829_v41 }
 0xa52   : > { %v1590_v45 = vpop.eup %1589 }
 0xa53   : > { %832 = vrot.lane.b32.xlu0 %v1590_v45, %s1652_s30 }
 0xac5   : > { %v833_v46 = vpop.permute.xlu0 %832 }
 0xac6   : > { %v835_v47 = vmul.f32 %v1588_v37, %v833_v46 }
 0xac8   : > { %v1840_v48 = vpack.c.bf16 %v835_v47, %v835_v47 }
 0xaca   : > { %847 = vrot.lane.b32.xlu1 %v1840_v48, %s1653_s22 }
 0xb3c   : > { %v848_v53 = vpop.permute.xlu1 %847 }
 0xb3d   : > { %1488 = vmatmul.mubr.msk.bf16.vlgmr.msra.gmra.mrb[16].mxu1 %vm524_vm1, %v848_v53 }
 0xb3e   : > { %1500 = vmatpush3.bf16.msra.mxu1 %v1751_v8  ;;  %1503 = vmatprep.mubr.msk.bf16.mxu1 %vm1650_vm0, %v1649_v6 }
 0xb3f   : > { %1501 = vmatprep.subr.bf16.mxu1 %v1649_v6 }
 0xb42   : > { %1502 = vmatpush3.bf16.msra.mxu1 %v1756_v10 }
 0xc10   : > { %v886_v55 = vpop.f32.mrb[16].mxu1 }
 0xc11   : > { %v892_v56 = vadd.f32 %v886_v55, %v489_v54  ;;  %v1489_v57 = vpop.f32.mrb[17].mxu1 }
 0xc12   : > { %v889_v58 = vpop.f32.mrb[18].mxu1 }
 0xc13   : > { %1591 = vtanh.f32 %v892_v56  ;;  %v1490_v59 = vpop.f32.mrb[19].mxu1  ;;  %v1367_v61 = vmul.f32 -1.442695, %v892_v56 }
 0xc14   : > { %v500_v59 = vadd.f32 %v1846_v51, %v1781_v22 }
 0xc15   : > { %1593 = vpow2.f32 %v1367_v61 }
 0xc1d   : > { %v1592_v60 = vpop.eup %1591 }
 0xc1e   : > { %902 = vrot.lane.b32.xlu0 %v1592_v60, %s1652_s30 }
 0xc1f   : > { %v1594_v62 = vpop.eup %1593 }
 0xc20   : > { %v896_v0 = vadd.f32 1.0, %v1594_v62 }
 0xc22   : > { %1595 = vrcp.f32 %v896_v0 }
 0xc2c   : > { %v1596_v1 = vpop.eup %1595 }
 0xc2d   : > { %v900_v4 = vmul.f32 %v1596_v1, %v829_v41 }
 0xc90   : > { %v903_v2 = vpop.permute.xlu0 %902 }
 0xc91   : > { %v905_v3 = vmul.f32 %v1596_v1, %v903_v2 }
 0xc93   : > { %907 = vrot.lane.b32.xlu1 %v905_v3, %s1653_s22 }
 0xd05   : > { %v908_v5 = vpop.permute.xlu1 %907 }
 0xd06   : > { %v910_v7 = vadd.f32 %v908_v5, %v900_v4 }
 0xd08   : > { %1597 = vtanh.f32 %v910_v7 }
 0xd12   : > { %v1598_v9 = vpop.eup %1597 }
 0xd13   : > { %913 = vrot.lane.b32.xlu0 %v1598_v9, %s1652_s30 }
 0xd85   : > { %v914_v11 = vpop.permute.xlu0 %913 }
 0xd86   : > { %v916_v12 = vmul.f32 %v1596_v1, %v914_v11 }
 0xd88   : > { %v1858_v13 = vpack.c.bf16 %v916_v12, %v916_v12 }
 0xd8a   : > { %928 = vrot.lane.b32.xlu1 %v1858_v13, %s1653_s22 }
 0xdfc   : > { %v929_v14 = vpop.permute.xlu1 %928 }
 0xdfd   : > { %1496 = vmatmul.mubr.msk.bf16.vlgmr.msra.gmra.mrb[8].mxu0 %vm524_vm1, %v929_v14 }
 0xdfe   : > { %1508 = vmatpush3.bf16.msra.mxu0 %v1751_v8  ;;  %1511 = vmatprep.mubr.msk.bf16.mxu0 %vm1650_vm0, %v1649_v6 }
 0xdff   : > { %1509 = vmatprep.subr.bf16.mxu0 %v1649_v6 }
 0xe02   : > { %1510 = vmatpush3.bf16.msra.mxu0 %v1756_v10 }
 0xed0   : > { %v967_v16 = vpop.f32.mrb[8].mxu0 }
 0xed1   : > { %v973_v17 = vadd.f32 %v967_v16, %v492_v15  ;;  %v1497_v18 = vpop.f32.mrb[9].mxu0 }
 0xed2   : > { %v970_v19 = vpop.f32.mrb[10].mxu0 }
 0xed3   : > { %1599 = vtanh.f32 %v973_v17  ;;  %v1498_v20 = vpop.f32.mrb[11].mxu0  ;;  %v1370_v23 = vmul.f32 -1.442695, %v973_v17 }
 0xed5   : > { %1601 = vpow2.f32 %v1370_v23 }
 0xedd   : > { %v1600_v21 = vpop.eup %1599 }
 0xede   : > { %983 = vrot.lane.b32.xlu0 %v1600_v21, %s1652_s30 }
 0xedf   : > { %v1602_v8 = vpop.eup %1601 }
 0xee0   : > { %v977_v25 = vadd.f32 1.0, %v1602_v8 }
 0xee2   : > { %1603 = vrcp.f32 %v977_v25 }
 0xeec   : > { %v1604_v27 = vpop.eup %1603 }
 0xeed   : > { %v981_v10 = vmul.f32 %v1604_v27, %v910_v7 }
 0xf50   : > { %v984_v6 = vpop.permute.xlu0 %983 }
 0xf51   : > { %v986_v28 = vmul.f32 %v1604_v27, %v984_v6 }
 0xf53   : > { %988 = vrot.lane.b32.xlu1 %v986_v28, %s1653_s22 }
 0xfc5   : > { %v989_v29 = vpop.permute.xlu1 %988 }
 0xfc6   : > { %v991_v30 = vadd.f32 %v989_v29, %v981_v10 }
 0xfc8   : > { %1605 = vtanh.f32 %v991_v30 }
 0xfd2   : > { %v1606_v31 = vpop.eup %1605 }
 0xfd3   : > { %994 = vrot.lane.b32.xlu0 %v1606_v31, %s1652_s30 }
0x1045   : > { %v995_v32 = vpop.permute.xlu0 %994 }
0x1046   : > { %v997_v33 = vmul.f32 %v1604_v27, %v995_v32 }
0x1048   : > { %v1872_v34 = vpack.c.bf16 %v997_v33, %v997_v33 }
0x104a   : > { %1009 = vrot.lane.b32.xlu1 %v1872_v34, %s1653_s22 }
0x10bc   : > { %v1010_v35 = vpop.permute.xlu1 %1009 }
0x10bd   : > { %1504 = vmatmul.mubr.msk.bf16.vlgmr.msra.gmra.mrb[20].mxu1 %vm524_vm1, %v1010_v35 }
0x1190   : > { %v1048_v37 = vpop.f32.mrb[20].mxu1 }
0x1191   : > { %v1054_v38 = vadd.f32 %v1048_v37, %v497_v36  ;;  %v1505_v39 = vpop.f32.mrb[21].mxu1 }
0x1192   : > { %v1051_v26 = vpop.f32.mrb[22].mxu1 }
0x1193   : > { %1607 = vtanh.f32 %v1054_v38  ;;  %v1506_v40 = vpop.f32.mrb[23].mxu1  ;;  %v1373_v43 = vmul.f32 -1.442695, %v1054_v38 }
0x1195   : > { %1609 = vpow2.f32 %v1373_v43 }
0x119d   : > { %v1608_v41 = vpop.eup %1607 }
0x119e   : > { %1064 = vrot.lane.b32.xlu0 %v1608_v41, %s1652_s30 }
0x119f   : > { %v1610_v44 = vpop.eup %1609 }
0x11a0   : > { %v1058_v45 = vadd.f32 1.0, %v1610_v44 }
0x11a2   : > { %1611 = vrcp.f32 %v1058_v45 }
0x11ac   : > { %v1612_v46 = vpop.eup %1611 }
0x11ad   : > { %v1062_v49 = vmul.f32 %v1612_v46, %v991_v30 }
0x1210   : > { %v1065_v47 = vpop.permute.xlu0 %1064 }
0x1211   : > { %v1067_v50 = vmul.f32 %v1612_v46, %v1065_v47 }
0x1213   : > { %1069 = vrot.lane.b32.xlu1 %v1067_v50, %s1653_s22 }
0x1285   : > { %v1070_v52 = vpop.permute.xlu1 %1069 }
0x1286   : > { %v1072_v53 = vadd.f32 %v1070_v52, %v1062_v49 }
0x1288   : > { %1613 = vtanh.f32 %v1072_v53 }
0x1292   : > { %v1614_v54 = vpop.eup %1613 }
0x1293   : > { %1075 = vrot.lane.b32.xlu0 %v1614_v54, %s1652_s30 }
0x1305   : > { %v1076_v55 = vpop.permute.xlu0 %1075 }
0x1306   : > { %v1078_v56 = vmul.f32 %v1612_v46, %v1076_v55 }
0x1308   : > { %v1079_v57 = vpack.c.bf16 %v1078_v56, %v1078_v56 }
0x130a   : > { %1090 = vrot.lane.b32.xlu1 %v1079_v57, %s1653_s22 }
0x137c   : > { %v1091_v58 = vpop.permute.xlu1 %1090 }
0x137d   : > { %1512 = vmatmul.mubr.msk.bf16.vlgmr.msra.gmra.mrb[12].mxu0 %vm524_vm1, %v1091_v58 }
0x1450   : > { %v1129_v60 = vpop.f32.mrb[12].mxu0 }
0x1451   : > { %v1135_v61 = vadd.f32 %v1129_v60, %v500_v59  ;;  %v1513_v62 = vpop.f32.mrb[13].mxu0 }
0x1452   : > { %v1132_v0 = vpop.f32.mrb[14].mxu0 }
0x1453   : > { %1615 = vtanh.f32 %v1135_v61  ;;  %v1514_v1 = vpop.f32.mrb[15].mxu0  ;;  %v1376_v3 = vmul.f32 -1.442695, %v1135_v61 }
0x1455   : > { %1617 = vpow2.f32 %v1376_v3 }
0x145d   : > { %v1616_v2 = vpop.eup %1615 }
0x145e   : > { %1145 = vrot.lane.b32.xlu0 %v1616_v2, %s1652_s30 }
0x145f   : > { %v1618_v4 = vpop.eup %1617 }
0x1460   : > { %v1139_v5 = vadd.f32 1.0, %v1618_v4 }
0x1462   : > { %1619 = vrcp.f32 %v1139_v5 }
0x146c   : > { %v1620_v7 = vpop.eup %1619 }
0x146d   : > { %v1143_v22 = vmul.f32 %v1620_v7, %v1072_v53 }
0x14d0   : > { %v1146_v9 = vpop.permute.xlu0 %1145 }
0x14d1   : > { %v1148_v11 = vmul.f32 %v1620_v7, %v1146_v9 }
0x14d3   : > { %1150 = vrot.lane.b32.xlu1 %v1148_v11, %s1653_s22 }
0x14d7   : > { %597 = vrot.lane.b32.xlu1 %v1791_v42, %s1653_s22 }
0x14db   : > { %759 = vrot.lane.b32.xlu1 %v1822_v24, %s1653_s22 }
0x14df   : > { %921 = vrot.lane.b32.xlu1 %v1858_v13, %s1653_s22 }
0x14e3   : > { %1083 = vrot.lane.b32.xlu1 %v1079_v57, %s1653_s22 }
0x1545   : > { %v1151_v51 = vpop.permute.xlu1 %1150 }
0x1546   : > { %v1153_v12 = vadd.f32 %v1151_v51, %v1143_v22 }
0x1548   : > { %1621 = vtanh.f32 %v1153_v12 }
0x1549   : > { %v598_v14 = vpop.permute.xlu1 %597 }
0x154a   : > { %601 = vst.msk [vmem:[#allocation2] sm:$0xf] %vm600_vm2, %v598_v14 }
0x154d   : > { %v760_v15 = vpop.permute.xlu1 %759 }
0x154e   : > { %763 = vst.msk [vmem:[#allocation2 + $0x8] sm:$0xf] %vm600_vm2, %v760_v15 }
0x1551   : > { %v922_v42 = vpop.permute.xlu1 %921 }
0x1552   : > { %v1622_v16 = vpop.eup %1621  ;;  %925 = vst.msk [vmem:[#allocation2 + $0x10] sm:$0xf] %vm600_vm2, %v922_v42 }
0x1553   : > { %1156 = vrot.lane.b32.xlu0 %v1622_v16, %s1652_s30 }
0x1555   : > { %v1084_v24 = vpop.permute.xlu1 %1083 }
0x1556   : > { %1087 = vst.msk [vmem:[#allocation2 + $0x18] sm:$0xf] %vm600_vm2, %v1084_v24 }
0x1557   : > { %678 = vrot.lane.b32.xlu0 %v1806_v63, %s1653_s22 }
0x155b   : > { %840 = vrot.lane.b32.xlu0 %v1840_v48, %s1653_s22 }
0x155f   : > { %1002 = vrot.lane.b32.xlu0 %v1872_v34, %s1653_s22 }
0x15c5   : > { %v1157_v13 = vpop.permute.xlu0 %1156 }
0x15c6   : > { %v1159_v17 = vmul.f32 %v1620_v7, %v1157_v13 }
0x15c8   : > { %v1390_v18 = vpack.c.bf16 %v1159_v17, %v1159_v17  ;;  %1170 = vrot.lane.b32.xlu1 %v1159_v17, %s1653_s22 }
0x15c9   : > { %v679_v19 = vpop.permute.xlu0 %678 }
0x15ca   : > { %682 = vst.msk [vmem:[#allocation2 + $0x4] sm:$0xf] %vm600_vm2, %v679_v19  ;;  %1164 = vrot.lane.b32.xlu0 %v1390_v18, %s1653_s22 }
0x15cd   : > { %v841_v20 = vpop.permute.xlu0 %840 }
0x15ce   : > { %844 = vst.msk [vmem:[#allocation2 + $0xc] sm:$0xf] %vm600_vm2, %v841_v20  ;;  %1175 = vrot.lane.b32.xlu0 %v1153_v12, %s1654_s6 }
0x15d1   : > { %v1003_v63 = vpop.permute.xlu0 %1002 }
0x15d2   : > { %1006 = vst.msk [vmem:[#allocation2 + $0x14] sm:$0xf] %vm600_vm2, %v1003_v63 }
0x163a   : > { %v1171_v48 = vpop.permute.xlu1 %1170 }
0x163b   : > { %1173 = vst.msk [vmem:[%s1725_s12] sm:$0xff] %vm524_vm1, %v1171_v48 }
0x163c   : > { %v1165_v21 = vpop.permute.xlu0 %1164 }
0x163d   : > { %1168 = vst.msk [vmem:[#allocation2 + $0x1c] sm:$0xf] %vm600_vm2, %v1165_v21 }
0x1640   : > { %v1176_v23 = vpop.permute.xlu0 %1175 }
0x1641   : > { %1178 = vst.msk [vmem:[%s1730_s15] sm:$0xff] %vm524_vm1, %v1176_v23 }
0x1642 PF: > { %s16_s20 = sadd.s32 1, %s1647_s20   ;;  %s1931_s18 = smov %s1643_s19 }
0x1643   : > { %p13_p6 = scmp.ge.s32.totalorder %s16_s20, 4   ;;  %s1932_s19 = smov %s1934_s21 }
0x1645   :  { %15 = sbr.rel (!%p13_p6) target bundleno = 2 (0x2), region = 141 }
0x164c   :  { %1224 = vsyncmov [#allocation4] }
0x164f   :  { %s1225_s7 = vpop.sfrf %1224 }
0x1650   :  { %p1380_p7 = scmp.ne.s32.totalorder %s1225_s7, 0 }
0x1652   :  { %1229 = shalt.err (%p1380_p7)  }

</bundles_post_ra>
